<compile_context>
chip_gen: v7x
topology: tpu7x:2x2x1
jax: 0.10.0
libtpu: 0.0.40
codegen_flags: <defaults>
</compile_context>

<pallas_src>
import jax
import jax.numpy as jnp
from jax.experimental import pallas as pl
from jax.experimental.pallas import tpu as pltpu


def _attention_kernel(x_ref, w_ref, b_ref, out_ref):
    # x_ref:   (TB, S, D)  VMEM   input embeddings (TB batch rows per step)
    # w_ref:   (1, 1, D)   VMEM   fused attention weight  (w1 @ w2)^T
    # b_ref:   (1, 1)      SMEM   fused attention bias    (b1 @ w2 + b2)
    # out_ref: (TB, D)     VMEM   attended features
    x = x_ref[...].astype(jnp.float32)                    # (TB, S, D)
    w = w_ref[...].astype(jnp.float32)                    # (1, 1, D)
    b = b_ref[0, 0]                                       # scalar (SMEM)

    # Fused attn MLP score per token: VPU multiply + XLU lane reduce.
    s = jnp.sum(x * w, axis=-1) + b                       # (TB, S)
    s = jnp.maximum(s, 0.0)                               # ReLU
    # Dropout(p=0.5) is identity in eval mode.

    # Numerically-stable softmax over the sequence axis, per batch row.
    m = jnp.max(s, axis=-1, keepdims=True)                # (TB, 1)
    e = jnp.exp(s - m)                                    # (TB, S)
    denom = jnp.sum(e, axis=-1, keepdims=True)            # (TB, 1)
    alpha = e * pl.reciprocal(denom, approx=True)         # (TB, S)

    # Weighted sum over the sequence axis -> (TB, D), sublane-dense store.
    out = jnp.sum(x * alpha[:, :, None], axis=1)          # (TB, D)
    out_ref[...] = out.astype(out_ref.dtype)


def _pick_tb(B, S, D, itemsize, requested=None, vmem_budget=8 << 20):
    """Largest multiple-of-8 batch tile whose (double-buffered) footprint fits
    a conservative VMEM budget, capped at 512 rows and at the padded batch."""
    if requested is not None:
        tb = max(8, (int(requested) // 8) * 8)
    else:
        per_row = 2 * S * D * itemsize + 2 * D * 4   # 2x in buf + 2x out buf
        tb = max(8, min(512, (vmem_budget // max(per_row, 1)) // 8 * 8))
    # Never exceed the batch (rounded up to a multiple of 8).
    b_ceil8 = ((B + 7) // 8) * 8
    return min(tb, max(8, b_ceil8))


def attention_forward(x, w1, b1, w2, b2, *, tb=None):
    """x: (B, S, D). w1: (D, A), b1: (1, A), w2: (A, 1), b2: (1, 1).

    Returns (B, D) in x.dtype. All kernel math is f32.
    """
    B, S, D = x.shape

    # Algebraic fusion of the two Linears (exact: no nonlinearity between them).
    w_eff = (w1.astype(jnp.float32) @ w2.astype(jnp.float32))            # (D, 1)
    w_eff = w_eff.reshape(1, 1, D)                                       # (1,1,D)
    b_eff = (b1.astype(jnp.float32) @ w2.astype(jnp.float32)
             + b2.astype(jnp.float32)).reshape(1, 1)                     # (1, 1)

    TB = _pick_tb(B, S, D, jnp.dtype(x.dtype).itemsize, requested=tb)
    Bp = ((B + TB - 1) // TB) * TB
    if Bp != B:
        x = jnp.pad(x, ((0, Bp - B), (0, 0), (0, 0)))

    out = pl.pallas_call(
        _attention_kernel,
        out_shape=jax.ShapeDtypeStruct((Bp, D), x.dtype),
        grid_spec=pl.GridSpec(
            grid=(Bp // TB,),
            in_specs=[
                pl.BlockSpec((TB, S, D), lambda i: (i, 0, 0)),      # x block
                pl.BlockSpec((1, 1, D), lambda i: (0, 0, 0)),       # fused weight
                pl.BlockSpec((1, 1), lambda i: (0, 0),
                             memory_space=pltpu.MemorySpace.SMEM),  # fused bias
            ],
            out_specs=pl.BlockSpec((TB, D), lambda i: (i, 0)),
        ),
        compiler_params=pltpu.CompilerParams(
            dimension_semantics=("parallel",),   # batch axis -> both TCs on v7x
        ),
    )(x, w_eff, b_eff)
    return out[:B]


def reference_forward(x, w1, b1, w2, b2):
    """Pure-JAX reference matching the PyTorch forward (eval mode)."""
    h = x @ w1 + b1                       # (B, S, A)
    s = h @ w2 + b2                       # (B, S, 1)
    s = jnp.maximum(s, 0.0)
    alpha = jax.nn.softmax(s, axis=1)     # softmax over seq
    return jnp.sum(x * alpha, axis=1)     # (B, D)


if __name__ == "__main__":
    B, S, D, A = 2, 8, 32, 16   # batch, seq, input_dim, attention_dim

    key = jax.random.PRNGKey(0)
    kx, kw1, kb1, kw2, kb2 = jax.random.split(key, 5)

    x = jax.random.normal(kx, (B, S, D), dtype=jnp.float32)
    # PyTorch Linear stores W as (out, in); we store the transposed (in, out)
    # so y = x @ W + b gives identical results.
    w1 = jax.random.normal(kw1, (D, A), dtype=jnp.float32) * 0.1
    b1 = jax.random.normal(kb1, (1, A), dtype=jnp.float32) * 0.1
    w2 = jax.random.normal(kw2, (A, 1), dtype=jnp.float32) * 0.1
    b2 = jax.random.normal(kb2, (1, 1), dtype=jnp.float32) * 0.1

    out = attention_forward(x, w1, b1, w2, b2)
    out = jax.block_until_ready(out)

    ref = reference_forward(x, w1, b1, w2, b2)
    assert out.shape == (B, D)
    # Tolerance covers the (exact-in-infinite-precision) weight fusion changing
    # fp summation order and the approx EUP reciprocal in the softmax.
    assert jnp.allclose(out, ref, atol=2e-3, rtol=2e-3), "mismatch vs reference"

    print("KERNEL_OK")
</pallas_src>

<mosaic_0001>
module attributes {stable_mosaic.version = 11 : i64} {
  func.func @_attention_kernel(%arg0: i32, %arg1: memref<8x8x32xf32, #tpu.memory_space<vmem>>, %arg2: memref<1x1x32xf32, #tpu.memory_space<vmem>>, %arg3: memref<1x1xf32, #tpu.memory_space<smem>>, %arg4: memref<8x32xf32, #tpu.memory_space<vmem>>) attributes {dimension_semantics = [#tpu.dimension_semantics<parallel>], iteration_bounds = array<i64: 1>, scalar_prefetch = 0 : i64, scratch_operands = 0 : i64, tpu.core_type = #tpu.core_type<tc>, window_params = [{transform_indices = @transform_0, window_bounds = array<i64: 8, 8, 32>}, {pipeline_mode = #tpu.pipeline_mode<synchronous>, transform_indices = @transform_1, window_bounds = array<i64: 1, 1, 32>}, {transform_indices = @transform_2, window_bounds = array<i64: 1, 1>}, {transform_indices = @transform_3, window_bounds = array<i64: 8, 32>}]} {
    %c0 = arith.constant 0 : index
    %c0_0 = arith.constant 0 : index
    %c0_1 = arith.constant 0 : index
    %0 = vector.load %arg1[%c0, %c0_0, %c0_1] : memref<8x8x32xf32, #tpu.memory_space<vmem>>, vector<8x8x32xf32>
    %c0_2 = arith.constant 0 : index
    %c0_3 = arith.constant 0 : index
    %c0_4 = arith.constant 0 : index
    %1 = vector.load %arg2[%c0_2, %c0_3, %c0_4] : memref<1x1x32xf32, #tpu.memory_space<vmem>>, vector<1x1x32xf32>
    %c0_5 = arith.constant 0 : index
    %c0_6 = arith.constant 0 : index
    %2 = memref.load %arg3[%c0_5, %c0_6] : memref<1x1xf32, #tpu.memory_space<smem>>
    %3 = vector.broadcast %1 : vector<1x1x32xf32> to vector<8x8x32xf32>
    %4 = arith.mulf %0, %3 : vector<8x8x32xf32>
    %cst = arith.constant dense<0.000000e+00> : vector<8x8xf32>
    %5 = vector.multi_reduction <add>, %4, %cst [2] : vector<8x8x32xf32> to vector<8x8xf32>
    %6 = vector.broadcast %2 : f32 to vector<8x8xf32>
    %7 = arith.addf %5, %6 : vector<8x8xf32>
    %cst_7 = arith.constant 0.000000e+00 : f32
    %8 = vector.broadcast %cst_7 : f32 to vector<8x8xf32>
    %9 = arith.maximumf %7, %8 : vector<8x8xf32>
    %cst_8 = arith.constant dense<0xFF800000> : vector<8xf32>
    %10 = vector.multi_reduction <maximumf>, %9, %cst_8 [1] : vector<8x8xf32> to vector<8xf32>
    %11 = vector.shape_cast %10 : vector<8xf32> to vector<8x1xf32>
    %12 = vector.broadcast %11 : vector<8x1xf32> to vector<8x8xf32>
    %13 = arith.subf %9, %12 : vector<8x8xf32>
    %14 = math.exp %13 : vector<8x8xf32>
    %cst_9 = arith.constant dense<0.000000e+00> : vector<8xf32>
    %15 = vector.multi_reduction <add>, %14, %cst_9 [1] : vector<8x8xf32> to vector<8xf32>
    %16 = vector.shape_cast %15 : vector<8xf32> to vector<8x1xf32>
    %17 = tpu.reciprocal %16 {approx = true} : vector<8x1xf32> -> vector<8x1xf32>
    %18 = vector.broadcast %17 : vector<8x1xf32> to vector<8x8xf32>
    %19 = arith.mulf %14, %18 : vector<8x8xf32>
    %20 = vector.shape_cast %19 : vector<8x8xf32> to vector<8x8x1xf32>
    %21 = vector.broadcast %20 : vector<8x8x1xf32> to vector<8x8x32xf32>
    %22 = arith.mulf %0, %21 : vector<8x8x32xf32>
    %cst_10 = arith.constant dense<0.000000e+00> : vector<8x32xf32>
    %23 = vector.multi_reduction <add>, %22, %cst_10 [1] : vector<8x8x32xf32> to vector<8x32xf32>
    %c0_11 = arith.constant 0 : index
    %c0_12 = arith.constant 0 : index
    %24 = vector.load %arg4[%c0_11, %c0_12] : memref<8x32xf32, #tpu.memory_space<vmem>>, vector<8x32xf32>
    tpu.vector_store %arg4[%c0_11, %c0_12], %23 {strides = array<i32>} : memref<8x32xf32, #tpu.memory_space<vmem>>, vector<8x32xf32>,
    return
  }
  func.func @transform_0(%arg0: i32) -> (i32, i32, i32) {
    %c0_i32 = arith.constant 0 : i32
    %c0_i32_0 = arith.constant 0 : i32
    %c0_i32_1 = arith.constant 0 : i32
    return %arg0, %c0_i32, %c0_i32_0 : i32, i32, i32
  }
  func.func @transform_1(%arg0: i32) -> (i32, i32, i32) {
    %c0_i32 = arith.constant 0 : i32
    %c0_i32_0 = arith.constant 0 : i32
    %c0_i32_1 = arith.constant 0 : i32
    %c0_i32_2 = arith.constant 0 : i32
    return %c0_i32, %c0_i32_0, %c0_i32_1 : i32, i32, i32
  }
  func.func @transform_2(%arg0: i32) -> (i32, i32) {
    %c0_i32 = arith.constant 0 : i32
    %c0_i32_0 = arith.constant 0 : i32
    %c0_i32_1 = arith.constant 0 : i32
    return %c0_i32, %c0_i32_0 : i32, i32
  }
  func.func @transform_3(%arg0: i32) -> (i32, i32) {
    %c0_i32 = arith.constant 0 : i32
    %c0_i32_0 = arith.constant 0 : i32
    return %arg0, %c0_i32 : i32, i32
  }
}

</mosaic_0001>

<bundles_post_ra>
// kernel: tpu_custom_call.1
= control target key start
LH: loop header
LB: loop body
LE: loop exit
PB: predicated region body
PF: predicated region fallthrough
CT: control target
= control target key end

     0   :  { %9 = vsyncpa [#allocation4], 0  ;;  %s748_s0 = inlined_call_operand.hbm [shape: f32[8,8,32], index: 0, kind: input, shape index: {}]   ;;  %s749_s1 = inlined_call_operand.vmem [shape: f32[1,1,32], index: 1, kind: input, shape index: {}]   ;;  %s750_s2 = inlined_call_operand.<no memory space> [shape: f32[1,1], index: 2, kind: input, shape index: {}]   ;;  %s751_s3 = inlined_call_operand.hbm [shape: f32[8,32], index: 3, kind: output, shape index: {}]  }
   0x1   :  { %10 = vsyncpa [#allocation5], 0  ;;  %s557_s12 = smov [#allocation3]   ;;  %s509_s16 = scalar_lea.hbm %s748_s0, 1024 }
   0x2   :  { %s16_s13 = sshll.u32 %s557_s12, 4  ;;  %p510_p0 = scmp.ne.s32.totalorder %s748_s0, %s509_s16  ;;  %s17_s13 = int_to_ptr.vmem [resolvable:$true] %s16_s13 }
   0x3   :  { %p513_p1 = scmp.lt.u32.totalorder %s509_s16, %s748_s0 }
   0x5   :  { %p515_p2 = pnand %p513_p1, %p510_p0 }
   0x7   :  { %518 = shalt.err (!%p515_p2)
}
   0x8   :  { %s519_s21 = scalar_lea.vmem %s17_s13, 1024  ;;  %p524_p4 = scmp.lt.s32.totalorder %s17_s13, %s17_s13 }
   0x9   :  { %p520_p3 = scmp.ne.s32.totalorder %s17_s13, %s519_s21  ;;  %p525_p5 = scmp.lt.s32.totalorder %s519_s21, %s519_s21 }
   0xb   :  { %p526_p6 = por %p525_p5, %p524_p4 }
   0xd   :  { %p527_p7 = pnand %p526_p6, %p520_p3 }
   0xf   :  { %530 = shalt.err (!%p527_p7)
}
  0x10   :  { %s558_s22 = smov 128   ;;  %s559_s23 = smov 8  }
  0x11   :  { %22 = dma.hbm_to_vmem [thread:$0]  %s748_s0, 1024, %s17_s13, [#allocation4], %s558_s22, %s558_s22, %s559_s23  }
  0x12   :  { %553 = dma.done.wait [#allocation4], 1024  }
  0x13   :  { %554 = vsyncadd [#allocation4], 4294966272  ;;  %v594_v0 = vld [vmem:[#allocation3] sm:$0xff]  ;;  %vm54_vm0 = vcmask 261120   ;;  %v599_v2 = vld [vmem:[#allocation3 + $0x10] sm:$0xff]  ;;  %v104_v25 = vlaneseq  ;;  %v79_v26 = vstv %s750_s2  ;;  %vm138_vm1 = vcmask 1041409  }
  0x14   :  { %v483_v1 = vld [vmem:[%s749_s1] ss:$0 sm:$0xff]  ;;  %v603_v5 = vld [vmem:[#allocation3 + $0x8] sm:$0xff]  ;;  %v605_v6 = vld [vmem:[#allocation3 + $0x18] sm:$0xff]  ;;  %vm140_vm2 = vcmask 1042434   ;;  %vm142_vm3 = vcmask 1043459  }
  0x15   :  { %v46_v3 = vmul.f32 %v483_v1, %v594_v0  ;;  %v48_v4 = vmul.f32 %v483_v1, %v599_v2  ;;  %v47_v7 = vmul.f32 %v483_v1, %v603_v5  ;;  %v49_v8 = vmul.f32 %v483_v1, %v605_v6  ;;  %v609_v9 = vld [vmem:[#allocation3 + $0x20] sm:$0xff]  ;;  %v611_v10 = vld [vmem:[#allocation3 + $0x28] sm:$0xff]  ;;  %v619_v17 = vld [vmem:[#allocation3 + $0x30] sm:$0xff]  ;;  %s561_s2 = smov [#allocation6]  }
  0x16   :  { %v50_v15 = vmul.f32 %v483_v1, %v609_v9  ;;  %v51_v16 = vmul.f32 %v483_v1, %v611_v10  ;;  %v621_v18 = vld [vmem:[#allocation3 + $0x38] sm:$0xff]  ;;  %v52_v21 = vmul.f32 %v483_v1, %v619_v17  ;;  %v105_v27 = vand.u32 127, %v104_v25  ;;  %s474_s28 = sshll.u32 %s561_s2, 4  ;;  %s475_s28 = int_to_ptr.vmem [resolvable:$true] %s474_s28 }
  0x17   :  { %v55_v11 = vsel %vm54_vm0, %v46_v3, 0.0  ;;  %v61_v12 = vsel %vm54_vm0, %v48_v4, 0.0  ;;  %v58_v13 = vsel %vm54_vm0, %v47_v7, 0.0  ;;  %v64_v14 = vsel %vm54_vm0, %v49_v8, 0.0  ;;  %s531_s29 = scalar_lea.vmem %s475_s28, 128  ;;  %p536_p9 = scmp.lt.s32.totalorder %s475_s28, %s475_s28 }
  0x18   :  { %56 = vadd.xlane.f32.xlu0 %v55_v11  ;;  %62 = vadd.xlane.f32.xlu1 %v61_v12  ;;  %v67_v19 = vsel %vm54_vm0, %v50_v15, 0.0  ;;  %v70_v20 = vsel %vm54_vm0, %v51_v16, 0.0  ;;  %v53_v22 = vmul.f32 %v483_v1, %v621_v18  ;;  %v73_v23 = vsel %vm54_vm0, %v52_v21, 0.0  ;;  %p532_p8 = scmp.ne.s32.totalorder %s475_s28, %s531_s29  ;;  %p537_p10 = scmp.lt.s32.totalorder %s531_s29, %s531_s29 }
  0x19   :  { %v632_v28 = vshrl.u32 %v104_v25, 7  ;;  %vm144_vm4 = vcmask 1044484   ;;  %vm146_vm5 = vcmask 1045509   ;;  %vm148_vm6 = vcmask 1046534  }
  0x1a   :  { %v76_v24 = vsel %vm54_vm0, %v53_v22, 0.0  ;;  %vm150_vm7 = vcmask 1047559   ;;  %vm153_vm8 = vcmask 64512   ;;  %v560_v12 = vmov 0   ;;  %p538_p11 = por %p537_p10, %p536_p9 }
  0x1b   :  { %v637_v33 = vsub.s32 %v105_v27, %v632_v28  ;;  %490 = vset.pattern.permute.xlu0 %v560_v12  ;;  %489 = vset.pattern.permute.xlu1 %v560_v12  ;;  %v168_v15 = vsub.s32 2, %v632_v28  ;;  %v172_v16 = vsub.s32 3, %v632_v28 }
  0x1c   :  { %59 = vadd.xlane.f32.xlu0 %v58_v13  ;;  %65 = vadd.xlane.f32.xlu1 %v64_v14  ;;  %v160_v13 = vsub.s32 0, %v632_v28  ;;  %v164_v14 = vsub.s32 1, %v632_v28  ;;  %p539_p12 = pnand %p538_p11, %p532_p8 }
  0x20   :  { %68 = vadd.xlane.f32.xlu0 %v67_v19  ;;  %71 = vadd.xlane.f32.xlu1 %v70_v20 }
  0x24   :  { %74 = vadd.xlane.f32.xlu0 %v73_v23  ;;  %77 = vadd.xlane.f32.xlu1 %v76_v24  ;;  %v176_v23 = vsub.s32 4, %v632_v28 }
  0xa5   :  { %v57_v29 = vpop.xlane.xlu0 %56  ;;  %v63_v30 = vpop.xlane.xlu1 %62 }
  0xa6   :  { %v80_v31 = vadd.f32 %v79_v26, %v57_v29  ;;  %v634_v32 = vadd.f32 %v79_v26, %v63_v30 }
  0xa8   :  { %v88_v34 = vmax.f32 %v80_v31, 0.0  ;;  %v90_v39 = vmax.f32 %v634_v32, 0.0  ;;  %v180_v31 = vsub.s32 5, %v632_v28 }
  0xa9   :  { %v60_v35 = vpop.xlane.xlu0 %59  ;;  %v66_v36 = vpop.xlane.xlu1 %65 }
  0xaa   :  { %v81_v37 = vadd.f32 %v79_v26, %v60_v35  ;;  %v83_v38 = vadd.f32 %v79_v26, %v66_v36  ;;  %v109_v42 = vrot.slane %v88_v34, %v637_v33  ;;  %v117_v49 = vrot.slane %v90_v39, %v637_v33 }
  0xac   :  { %v89_v40 = vmax.f32 %v81_v37, 0.0  ;;  %v91_v41 = vmax.f32 %v83_v38, 0.0  ;;  %v184_v37 = vsub.s32 6, %v632_v28 }
  0xad   :  { %v69_v43 = vpop.xlane.xlu0 %68  ;;  %v72_v44 = vpop.xlane.xlu1 %71 }
  0xae   :  { %v113_v45 = vrot.slane %v89_v40, %v637_v33  ;;  %v121_v46 = vrot.slane %v91_v41, %v637_v33  ;;  %v84_v47 = vadd.f32 %v79_v26, %v69_v43  ;;  %v85_v48 = vadd.f32 %v79_v26, %v72_v44 }
  0xb0   :  { %v139_v50 = vsel %vm138_vm1, %v113_v45, %v109_v42  ;;  %v92_v51 = vmax.f32 %v84_v47, 0.0  ;;  %v93_v52 = vmax.f32 %v85_v48, 0.0 }
  0xb1   :  { %v141_v53 = vsel %vm140_vm2, %v117_v49, %v139_v50  ;;  %v75_v54 = vpop.xlane.xlu0 %74  ;;  %v78_v55 = vpop.xlane.xlu1 %77 }
  0xb2   :  { %v143_v56 = vsel %vm142_vm3, %v121_v46, %v141_v53  ;;  %v125_v57 = vrot.slane %v92_v51, %v637_v33  ;;  %v86_v58 = vadd.f32 %v79_v26, %v75_v54  ;;  %v129_v59 = vrot.slane %v93_v52, %v637_v33 }
  0xb3   :  { %v87_v60 = vadd.f32 %v79_v26, %v78_v55 }
  0xb4   :  { %v145_v61 = vsel %vm144_vm4, %v125_v57, %v143_v56  ;;  %v94_v62 = vmax.f32 %v86_v58, 0.0 }
  0xb5   :  { %v95_v63 = vmax.f32 %v87_v60, 0.0  ;;  %v147_v4 = vsel %vm146_vm5, %v129_v59, %v145_v61 }
  0xb6   :  { %v133_v1 = vrot.slane %v94_v62, %v637_v33 }
  0xb7   :  { %v137_v3 = vrot.slane %v95_v63, %v637_v33 }
  0xb8   :  { %v149_v7 = vsel %vm148_vm6, %v133_v1, %v147_v4 }
  0xb9   :  { %v151_v8 = vsel %vm150_vm7, %v137_v3, %v149_v7 }
  0xba   :  { %v154_v11 = vsel %vm153_vm8, %v151_v8, -inf }
  0xbb   :  { %155 = vmax.xlane.f32.xlu0 %v154_v11 }
 0x148   :  { %v156_v19 = vpop.xlane.xlu0 %155 }
 0x149   :  { %v161_v20 = vrot.slane %v156_v19, %v160_v13  ;;  %v165_v21 = vrot.slane %v156_v19, %v164_v14  ;;  %v169_v22 = vrot.slane %v156_v19, %v168_v15  ;;  %v173_v24 = vrot.slane %v156_v19, %v172_v16 }
 0x14a   :  { %v177_v32 = vrot.slane %v156_v19, %v176_v23  ;;  %v181_v38 = vrot.slane %v156_v19, %v180_v31 }
 0x14b   :  { %v198_v25 = vsub.f32 %v88_v34, %v161_v20  ;;  %v199_v26 = vsub.f32 %v89_v40, %v165_v21  ;;  %v200_v27 = vsub.f32 %v90_v39, %v169_v22  ;;  %v201_v35 = vsub.f32 %v91_v41, %v173_v24 }
 0x14c   :  { %v202_v42 = vsub.f32 %v92_v51, %v177_v32  ;;  %v188_v39 = vsub.s32 7, %v632_v28  ;;  %v185_v40 = vrot.slane %v156_v19, %v184_v37  ;;  %v203_v43 = vsub.f32 %v93_v52, %v181_v38 }
 0x14d   :  { %v206_v29 = vmul.f32 1.442695, %v198_v25  ;;  %v208_v30 = vmul.f32 1.442695, %v199_v26  ;;  %v210_v36 = vmul.f32 1.442695, %v200_v27 }
 0x14e   :  { %v212_v34 = vmul.f32 1.442695, %v201_v35  ;;  %v214_v44 = vmul.f32 1.442695, %v202_v42  ;;  %v189_v46 = vrot.slane %v156_v19, %v188_v39  ;;  %v204_v47 = vsub.f32 %v94_v62, %v185_v40 }
 0x14f   :  { %491 = vpow2.f32 %v206_v29  ;;  %v216_v48 = vmul.f32 1.442695, %v203_v43 }
 0x150   :  { %493 = vpow2.f32 %v208_v30  ;;  %v205_v50 = vsub.f32 %v95_v63, %v189_v46  ;;  %v218_v51 = vmul.f32 1.442695, %v204_v47 }
 0x151   :  { %495 = vpow2.f32 %v210_v36 }
 0x152   :  { %497 = vpow2.f32 %v212_v34  ;;  %v220_v52 = vmul.f32 1.442695, %v205_v50 }
 0x153   :  { %499 = vpow2.f32 %v214_v44 }
 0x154   :  { %501 = vpow2.f32 %v216_v48 }
 0x155   :  { %503 = vpow2.f32 %v218_v51 }
 0x156   :  { %505 = vpow2.f32 %v220_v52 }
 0x159   :  { %v492_v41 = vpop.eup %491 }
 0x15a   :  { %v494_v45 = vpop.eup %493  ;;  %231 = vperm.xlu1 %489, %v492_v41  }
 0x15b   :  { %234 = vperm.xlu0 %490, %v494_v45   ;;  %v496_v49 = vpop.eup %495 }
 0x15c   :  { %v498_v53 = vpop.eup %497 }
 0x15d   :  { %v500_v54 = vpop.eup %499 }
 0x15e   :  { %237 = vperm.xlu1 %489, %v496_v49   ;;  %v502_v55 = vpop.eup %501 }
 0x15f   :  { %v504_v56 = vpop.eup %503 }
 0x160   :  { %v506_v57 = vpop.eup %505 }
 0x162   :  { %240 = vperm.xlu1 %489, %v498_v53  }
 0x166   :  { %243 = vperm.xlu1 %489, %v500_v54  }
 0x16a   :  { %246 = vperm.xlu1 %489, %v502_v55  }
 0x16e   :  { %249 = vperm.xlu1 %489, %v504_v56  }
 0x172   :  { %252 = vperm.xlu1 %489, %v506_v57  }
 0x1d9   :  { %v232_v58 = vpop.permute.xlu1 %231 }
 0x1da   :  { %v235_v62 = vpop.permute.xlu0 %234  ;;  %v257_v3 = vrot.slane %v232_v58, %v637_v33 }
 0x1db   :  { %v261_v1 = vrot.slane %v235_v62, %v637_v33 }
 0x1dd   :  { %v238_v59 = vpop.permute.xlu1 %237  ;;  %v286_v12 = vsel %vm138_vm1, %v261_v1, %v257_v3 }
 0x1de   :  { %v265_v4 = vrot.slane %v238_v59, %v637_v33 }
 0x1e0   :  { %v287_v20 = vsel %vm140_vm2, %v265_v4, %v286_v12 }
 0x1e1   :  { %v241_v60 = vpop.permute.xlu1 %240 }
 0x1e2   :  { %v269_v7 = vrot.slane %v241_v60, %v637_v33 }
 0x1e4   :  { %v288_v22 = vsel %vm142_vm3, %v269_v7, %v287_v20 }
 0x1e5   :  { %v244_v61 = vpop.permute.xlu1 %243 }
 0x1e6   :  { %v273_v8 = vrot.slane %v244_v61, %v637_v33 }
 0x1e8   :  { %v289_v24 = vsel %vm144_vm4, %v273_v8, %v288_v22 }
 0x1e9   :  { %v247_v63 = vpop.permute.xlu1 %246 }
 0x1ea   :  { %v277_v19 = vrot.slane %v247_v63, %v637_v33 }
 0x1ec   :  { %v290_v26 = vsel %vm146_vm5, %v277_v19, %v289_v24 }
 0x1ed   :  { %v250_v11 = vpop.permute.xlu1 %249 }
 0x1ee   :  { %v281_v21 = vrot.slane %v250_v11, %v637_v33 }
 0x1f0   :  { %v291_v29 = vsel %vm148_vm6, %v281_v21, %v290_v26 }
 0x1f1   :  { %v253_v25 = vpop.permute.xlu1 %252 }
 0x1f2   :  { %v285_v27 = vrot.slane %v253_v25, %v637_v33 }
 0x1f4   :  { %v292_v30 = vsel %vm150_vm7, %v285_v27, %v291_v29 }
 0x1f5   :  { %v294_v32 = vsel %vm153_vm8, %v292_v30, 0.0 }
 0x1f6   :  { %295 = vadd.xlane.f32.xlu1 %v294_v32 }
 0x283   :  { %v296_v35 = vpop.xlane.xlu1 %295 }
 0x284   :  { %507 = vrcp.f32 %v296_v35 }
 0x28e   :  { %v508_v36 = vpop.eup %507 }
 0x28f   :  { %v302_v38 = vrot.slane %v508_v36, %v160_v13  ;;  %v306_v34 = vrot.slane %v508_v36, %v164_v14  ;;  %v310_v33 = vrot.slane %v508_v36, %v168_v15  ;;  %v314_v44 = vrot.slane %v508_v36, %v172_v16 }
 0x290   :  { %v318_v47 = vrot.slane %v508_v36, %v176_v23  ;;  %v322_v14 = vrot.slane %v508_v36, %v180_v31  ;;  %v326_v15 = vrot.slane %v508_v36, %v184_v37  ;;  %v330_v16 = vrot.slane %v508_v36, %v188_v39 }
 0x291   :  { %v339_v42 = vmul.f32 %v492_v41, %v302_v38  ;;  %v340_v40 = vmul.f32 %v494_v45, %v306_v34  ;;  %v341_v43 = vmul.f32 %v496_v49, %v310_v33  ;;  %v342_v46 = vmul.f32 %v498_v53, %v314_v44 }
 0x292   :  { %v343_v13 = vmul.f32 %v500_v54, %v318_v47  ;;  %v344_v41 = vmul.f32 %v502_v55, %v322_v14  ;;  %v345_v45 = vmul.f32 %v504_v56, %v326_v15  ;;  %v346_v48 = vmul.f32 %v506_v57, %v330_v16 }
 0x293   :  { %349 = vperm.xlu0 %490, %v339_v42  }
 0x297   :  { %354 = vperm.xlu0 %490, %v340_v40  }
 0x29b   :  { %359 = vperm.xlu0 %490, %v341_v43  }
 0x29f   :  { %364 = vperm.xlu0 %490, %v342_v46  }
 0x2a3   :  { %369 = vperm.xlu0 %490, %v343_v13  }
 0x2a7   :  { %374 = vperm.xlu0 %490, %v344_v41  }
 0x2ab   :  { %379 = vperm.xlu0 %490, %v345_v45  }
 0x2af   :  { %384 = vperm.xlu0 %490, %v346_v48  }
 0x312   :  { %v350_v49 = vpop.permute.xlu0 %349 }
 0x313   :  { %v387_v31 = vmul.f32 %v350_v49, %v594_v0 }
 0x315   :  { %v395_v28 = vsel %vm54_vm0, %v387_v31, 0.0 }
 0x316   :  { %v355_v23 = vpop.permute.xlu0 %354  ;;  %v396_v58 = vrot.slane %v395_v28, 4 }
 0x317   :  { %v388_v50 = vmul.f32 %v355_v23, %v603_v5 }
 0x318   :  { %v397_v62 = vadd.f32 %v396_v58, %v395_v28 }
 0x319   :  { %v402_v52 = vsel %vm54_vm0, %v388_v50, 0.0 }
 0x31a   :  { %v360_v51 = vpop.permute.xlu0 %359  ;;  %v403_v55 = vrot.slane %v402_v52, 4  ;;  %v398_v12 = vrot.slane %v397_v62, 2 }
 0x31b   :  { %v389_v53 = vmul.f32 %v360_v51, %v599_v2 }
 0x31c   :  { %v404_v60 = vadd.f32 %v403_v55, %v402_v52  ;;  %v399_v29 = vadd.f32 %v398_v12, %v397_v62 }
 0x31d   :  { %v409_v37 = vsel %vm54_vm0, %v389_v53, 0.0 }
 0x31e   :  { %v365_v54 = vpop.permute.xlu0 %364  ;;  %v410_v56 = vrot.slane %v409_v37, 4 }
 0x31f   :  { %v390_v39 = vmul.f32 %v365_v54, %v605_v6  ;;  %v405_v6 = vrot.slane %v404_v60, 2 }
 0x320   :  { %v411_v2 = vadd.f32 %v410_v56, %v409_v37 }
 0x321   :  { %v416_v57 = vsel %vm54_vm0, %v390_v39, 0.0  ;;  %v406_v24 = vadd.f32 %v405_v6, %v404_v60 }
 0x322   :  { %v417_v5 = vrot.slane %v416_v57, 4  ;;  %v370_v59 = vpop.permute.xlu0 %369  ;;  %v412_v8 = vrot.slane %v411_v2, 2 }
 0x323   :  { %v391_v0 = vmul.f32 %v370_v59, %v609_v9  ;;  %v407_v42 = vrot.slane %v406_v24, 1 }
 0x324   :  { %v418_v63 = vadd.f32 %v417_v5, %v416_v57  ;;  %v413_v26 = vadd.f32 %v412_v8, %v411_v2 }
 0x325   :  { %v423_v61 = vsel %vm54_vm0, %v391_v0, 0.0  ;;  %v408_v14 = vadd.f32 %v407_v42, %v406_v24 }
 0x326   :  { %v424_v1 = vrot.slane %v423_v61, 4  ;;  %v375_v3 = vpop.permute.xlu0 %374  ;;  %v419_v19 = vrot.slane %v418_v63, 2  ;;  %v414_v33 = vrot.slane %v413_v26, 1 }
 0x327   :  { %v392_v4 = vmul.f32 %v375_v3, %v611_v10 }
 0x328   :  { %v425_v7 = vadd.f32 %v424_v1, %v423_v61  ;;  %v420_v30 = vadd.f32 %v419_v19, %v418_v63  ;;  %v415_v16 = vadd.f32 %v414_v33, %v413_v26 }
 0x329   :  { %v430_v11 = vsel %vm54_vm0, %v392_v4, 0.0 }
 0x32a   :  { %v431_v20 = vrot.slane %v430_v11, 4  ;;  %v380_v21 = vpop.permute.xlu0 %379  ;;  %v426_v9 = vrot.slane %v425_v7, 2  ;;  %v421_v44 = vrot.slane %v420_v30, 1 }
 0x32b   :  { %v393_v22 = vmul.f32 %v380_v21, %v619_v17  ;;  %v400_v17 = vrot.slane %v399_v29, 1 }
 0x32c   :  { %v432_v25 = vadd.f32 %v431_v20, %v430_v11  ;;  %v427_v36 = vadd.f32 %v426_v9, %v425_v7  ;;  %v422_v49 = vadd.f32 %v421_v44, %v420_v30 }
 0x32d   :  { %v437_v27 = vsel %vm54_vm0, %v393_v22, 0.0  ;;  %v401_v48 = vadd.f32 %v400_v17, %v399_v29 }
 0x32e   :  { %v433_v10 = vrot.slane %v432_v25, 2  ;;  %v438_v32 = vrot.slane %v437_v27, 4  ;;  %v385_v35 = vpop.permute.xlu0 %384  ;;  %v428_v13 = vrot.slane %v427_v36, 1 }
 0x32f   :  { %v394_v38 = vmul.f32 %v385_v35, %v621_v18  ;;  %v459_v51 = vsel %vm138_vm1, %v408_v14, %v401_v48 }
 0x330   :  { %v434_v34 = vadd.f32 %v433_v10, %v432_v25  ;;  %v439_v40 = vadd.f32 %v438_v32, %v437_v27  ;;  %v429_v50 = vadd.f32 %v428_v13, %v427_v36  ;;  %v460_v52 = vsel %vm140_vm2, %v415_v16, %v459_v51 }
 0x331   :  { %v444_v43 = vsel %vm54_vm0, %v394_v38, 0.0  ;;  %v461_v54 = vsel %vm142_vm3, %v422_v49, %v460_v52 }
 0x332   :  { %v440_v46 = vrot.slane %v439_v40, 2  ;;  %v445_v47 = vrot.slane %v444_v43, 4  ;;  %v435_v41 = vrot.slane %v434_v34, 1  ;;  %v462_v39 = vsel %vm144_vm4, %v429_v50, %v461_v54 }
 0x334   :  { %v441_v15 = vadd.f32 %v440_v46, %v439_v40  ;;  %v446_v45 = vadd.f32 %v445_v47, %v444_v43  ;;  %v436_v31 = vadd.f32 %v435_v41, %v434_v34 }
 0x336   :  { %v442_v23 = vrot.slane %v441_v15, 1  ;;  %v447_v18 = vrot.slane %v446_v45, 2  ;;  %v463_v56 = vsel %vm146_vm5, %v436_v31, %v462_v39 }
 0x338   :  { %v448_v53 = vadd.f32 %v447_v18, %v446_v45  ;;  %v443_v37 = vadd.f32 %v442_v23, %v441_v15 }
 0x33a   :  { %v449_v28 = vrot.slane %v448_v53, 1  ;;  %v464_v57 = vsel %vm148_vm6, %v443_v37, %v463_v56 }
 0x33c   :  { %v450_v55 = vadd.f32 %v449_v28, %v448_v53 }
 0x33e   :  { %v465_v58 = vsel %vm150_vm7, %v450_v55, %v464_v57 }
 0x33f   :  { %467 = vst.msk [vmem:[#allocation6] sm:$0xff] %vm54_vm0, %v465_v58 }
 0x340   :  { %542 = shalt.err (!%p539_p12)
}
 0x341   :  { %s543_s5 = scalar_lea.hbm %s751_s3, 128 }
 0x342   :  { %p544_p13 = scmp.ne.s32.totalorder %s751_s3, %s543_s5  ;;  %p547_p0 = scmp.lt.u32.totalorder %s543_s5, %s751_s3 }
 0x344   :  { %p549_p1 = pnand %p547_p0, %p544_p13 }
 0x346   :  { %552 = shalt.err (!%p549_p1)
}
 0x347   :  { %477 = dma.vmem_to_hbm [thread:$0]  %s475_s28, 128, %s751_s3, [#allocation5]  }
 0x348   :  { %555 = dma.done.wait [#allocation5], 128  }
 0x349   :  { %556 = vsyncadd [#allocation5], 4294967168 }
 0x34a   :  { %481 = vsyncpa [#allocation4], 1 }
 0x34b   :  { %482 = vsyncpa [#allocation5], 1 }

</bundles_post_ra>
